<compile_context>
chip_gen: v7x
topology: tpu7x:2x2x1
jax: 0.10.0
libtpu: 0.0.40
codegen_flags: <defaults>
</compile_context>

<pallas_src>
import jax
import jax.numpy as jnp
from jax.experimental import pallas as pl
from jax.experimental.pallas import tpu as pltpu


def basic_block_kernel(x_ref, m1_ref, m2_ref, sd_ref, su_ref,
                       s1_ref, b1_ref, s2_ref, b2_ref, o_ref):
    """One batch element per grid step, folded (W*C) lane-dense layout.

    x_ref  : (1, H, W*Cin)        bf16 input
    m1_ref : (3, W*Cin, W*Cout)   bf16 conv1 band matrices (one per kernel row kh)
    m2_ref : (3, W*Cout, W*Cout)  bf16 conv2 band matrices
    sd_ref : (H, H)               bf16 shift-down matrix (row h <- row h-1, row 0 = 0)
    su_ref : (H, H)               bf16 shift-up matrix   (row h <- row h+1, row H-1 = 0)
    s*/b*  : (1, W*Cout)          f32 folded BN scale / bias (per-channel, tiled over W)
    o_ref  : (1, H, W*Cout)       f32 output
    """
    f32 = jnp.float32
    bf16 = jnp.bfloat16

    x = x_ref[0]              # (H, W*Cin) bf16
    sd = sd_ref[...]
    su = su_ref[...]

    # Vertical (H) halo via exact 0/1 permutation matmuls on the MXU (no relayouts,
    # zero rows at the image border come for free from the zero rows of sd/su).
    x_dn = jnp.dot(sd, x, preferred_element_type=f32).astype(bf16)   # row h = x[h-1]
    x_up = jnp.dot(su, x, preferred_element_type=f32).astype(bf16)   # row h = x[h+1]

    # conv1: three band matmuls, K = W*Cin, f32 accumulation.
    acc1 = (jnp.dot(x_dn, m1_ref[0], preferred_element_type=f32)
            + jnp.dot(x,    m1_ref[1], preferred_element_type=f32)
            + jnp.dot(x_up, m1_ref[2], preferred_element_type=f32))

    # BN1 (folded inference affine) + ReLU, bf16 for the second conv.
    mid = jnp.maximum(acc1 * s1_ref[...] + b1_ref[...], 0.0).astype(bf16)

    mid_dn = jnp.dot(sd, mid, preferred_element_type=f32).astype(bf16)
    mid_up = jnp.dot(su, mid, preferred_element_type=f32).astype(bf16)

    # conv2.
    acc2 = (jnp.dot(mid_dn, m2_ref[0], preferred_element_type=f32)
            + jnp.dot(mid,    m2_ref[1], preferred_element_type=f32)
            + jnp.dot(mid_up, m2_ref[2], preferred_element_type=f32))

    # BN2 + identity residual + ReLU (residual is the already-resident input block).
    out = acc2 * s2_ref[...] + b2_ref[...] + x.astype(f32)
    o_ref[0] = jnp.maximum(out, 0.0)


def _band_matrices(w_hwio, W):
    """(3, 3, Cin, Cout) conv weights -> (3, W*Cin, W*Cout) block-tridiagonal
    matrices (one per kernel row kh). SAME horizontal padding is encoded by the
    missing off-band blocks at w = 0 and w = W-1."""
    _, _, cin, cout = w_hwio.shape
    m = jnp.zeros((3, W * cin, W * cout), w_hwio.dtype)
    for kw in range(3):
        for w in range(W):
            wi = w + kw - 1
            if 0 <= wi < W:
                m = m.at[:, wi * cin:(wi + 1) * cin,
                         w * cout:(w + 1) * cout].set(w_hwio[:, kw])
    return m


def basic_block(x_nhwc, w1, w2, scale1, bias1, scale2, bias2):
    """x_nhwc: (N, H, W, Cin) f32; w*: (3,3,Cin,Cout) HWIO; scale/bias: (Cout,).
    Returns (N, H, W, Cout) f32."""
    N, H, W, Cin = x_nhwc.shape
    Cout = w1.shape[-1]
    assert Cin == Cout, "identity residual requires inplanes == planes"

    wcin, wcout = W * Cin, W * Cout

    # Lane-dense folded layout + bf16 operands (f32 accumulation in-kernel).
    xf = x_nhwc.reshape(N, H, wcin).astype(jnp.bfloat16)
    m1 = _band_matrices(w1, W).astype(jnp.bfloat16)
    m2 = _band_matrices(w2, W).astype(jnp.bfloat16)
    sd = jnp.eye(H, k=-1, dtype=jnp.bfloat16)
    su = jnp.eye(H, k=1, dtype=jnp.bfloat16)

    s1f = jnp.tile(scale1.astype(jnp.float32), W).reshape(1, wcout)
    b1f = jnp.tile(bias1.astype(jnp.float32), W).reshape(1, wcout)
    s2f = jnp.tile(scale2.astype(jnp.float32), W).reshape(1, wcout)
    b2f = jnp.tile(bias2.astype(jnp.float32), W).reshape(1, wcout)

    const3 = lambda n: (0, 0, 0)
    const2 = lambda n: (0, 0)

    out = pl.pallas_call(
        basic_block_kernel,
        out_shape=jax.ShapeDtypeStruct((N, H, wcout), jnp.float32),
        grid_spec=pltpu.PrefetchScalarGridSpec(
            num_scalar_prefetch=0,
            grid=(N,),
            in_specs=[
                pl.BlockSpec((1, H, wcin), lambda n: (n, 0, 0)),
                pl.BlockSpec((3, wcin, wcout), const3),
                pl.BlockSpec((3, wcout, wcout), const3),
                pl.BlockSpec((H, H), const2),
                pl.BlockSpec((H, H), const2),
                pl.BlockSpec((1, wcout), const2),
                pl.BlockSpec((1, wcout), const2),
                pl.BlockSpec((1, wcout), const2),
                pl.BlockSpec((1, wcout), const2),
            ],
            out_specs=pl.BlockSpec((1, H, wcout), lambda n: (n, 0, 0)),
        ),
        compiler_params=pltpu.CompilerParams(
            dimension_semantics=("parallel",)),
    )(xf, m1, m2, sd, su, s1f, b1f, s2f, b2f)

    return out.reshape(N, H, W, Cout)


def _fold_bn(gamma, beta, running_mean, running_var, eps=1e-5):
    scale = gamma / jnp.sqrt(running_var + eps)
    bias = beta - running_mean * scale
    return scale, bias


def _reference(x_nhwc, w1, w2, s1, b1, s2, b2):
    """Pure-JAX reference with matching precision (bf16 operands, f32 accumulate)."""
    dn = ("NHWC", "HWIO", "NHWC")
    xb = x_nhwc.astype(jnp.bfloat16)
    c1 = jax.lax.conv_general_dilated(
        xb, w1.astype(jnp.bfloat16), (1, 1), "SAME",
        dimension_numbers=dn, preferred_element_type=jnp.float32)
    o1 = jnp.maximum(c1 * s1.reshape(1, 1, 1, -1) + b1.reshape(1, 1, 1, -1), 0.0)
    c2 = jax.lax.conv_general_dilated(
        o1.astype(jnp.bfloat16), w2.astype(jnp.bfloat16), (1, 1), "SAME",
        dimension_numbers=dn, preferred_element_type=jnp.float32)
    o2 = c2 * s2.reshape(1, 1, 1, -1) + b2.reshape(1, 1, 1, -1) + xb.astype(jnp.float32)
    return jnp.maximum(o2, 0.0)


if __name__ == "__main__":
    # BasicBlock(inplanes=8, planes=8, stride=1); PyTorch-style NCHW input.
    N, C, H, W = 2, 8, 16, 16

    key = jax.random.PRNGKey(0)
    k = jax.random.split(key, 8)

    x_nchw = jax.random.normal(k[0], (N, C, H, W), jnp.float32)
    x_nhwc = jnp.transpose(x_nchw, (0, 2, 3, 1))

    w1 = jax.random.normal(k[1], (3, 3, C, C), jnp.float32) * 0.1
    w2 = jax.random.normal(k[2], (3, 3, C, C), jnp.float32) * 0.1

    gamma1 = 1.0 + 0.1 * jax.random.normal(k[3], (C,), jnp.float32)
    beta1 = 0.1 * jax.random.normal(k[4], (C,), jnp.float32)
    rmean1 = 0.05 * jax.random.normal(k[5], (C,), jnp.float32)
    rvar1 = 1.0 + 0.1 * jnp.abs(jax.random.normal(k[6], (C,), jnp.float32))
    gamma2 = jnp.ones((C,), jnp.float32)
    beta2 = jnp.zeros((C,), jnp.float32)
    rmean2 = jnp.zeros((C,), jnp.float32)
    rvar2 = jnp.ones((C,), jnp.float32)

    s1, b1 = _fold_bn(gamma1, beta1, rmean1, rvar1)
    s2, b2 = _fold_bn(gamma2, beta2, rmean2, rvar2)

    out = basic_block(x_nhwc, w1, w2, s1, b1, s2, b2)
    out = jax.block_until_ready(out)

    ref = _reference(x_nhwc, w1, w2, s1, b1, s2, b2)
    assert out.shape == (N, H, W, C)
    assert jnp.allclose(out, ref, atol=1e-2, rtol=1e-2), (
        "mismatch vs reference, max abs diff = "
        f"{jnp.max(jnp.abs(out - ref))}")

    # Back to NCHW to match the PyTorch interface if a caller needs it.
    _ = jnp.transpose(out, (0, 3, 1, 2))

    print("KERNEL_OK")
</pallas_src>

<mosaic_0001>
module attributes {stable_mosaic.version = 11 : i64} {
  func.func @basic_block_kernel(%arg0: i32, %arg1: memref<1x16x128xbf16, #tpu.memory_space<vmem>>, %arg2: memref<3x128x128xbf16, #tpu.memory_space<vmem>>, %arg3: memref<3x128x128xbf16, #tpu.memory_space<vmem>>, %arg4: memref<16x16xbf16, #tpu.memory_space<vmem>>, %arg5: memref<16x16xbf16, #tpu.memory_space<vmem>>, %arg6: memref<1x128xf32, #tpu.memory_space<vmem>>, %arg7: memref<1x128xf32, #tpu.memory_space<vmem>>, %arg8: memref<1x128xf32, #tpu.memory_space<vmem>>, %arg9: memref<1x128xf32, #tpu.memory_space<vmem>>, %arg10: memref<1x16x128xf32, #tpu.memory_space<vmem>>) attributes {dimension_semantics = [#tpu.dimension_semantics<parallel>], iteration_bounds = array<i64: 2>, scalar_prefetch = 0 : i64, scratch_operands = 0 : i64, tpu.core_type = #tpu.core_type<tc>, window_params = [{transform_indices = @transform_0, window_bounds = array<i64: 1, 16, 128>}, {pipeline_mode = #tpu.pipeline_mode<synchronous>, transform_indices = @transform_1, window_bounds = array<i64: 3, 128, 128>}, {pipeline_mode = #tpu.pipeline_mode<synchronous>, transform_indices = @transform_2, window_bounds = array<i64: 3, 128, 128>}, {pipeline_mode = #tpu.pipeline_mode<synchronous>, transform_indices = @transform_3, window_bounds = array<i64: 16, 16>}, {pipeline_mode = #tpu.pipeline_mode<synchronous>, transform_indices = @transform_4, window_bounds = array<i64: 16, 16>}, {pipeline_mode = #tpu.pipeline_mode<synchronous>, transform_indices = @transform_5, window_bounds = array<i64: 1, 128>}, {pipeline_mode = #tpu.pipeline_mode<synchronous>, transform_indices = @transform_6, window_bounds = array<i64: 1, 128>}, {pipeline_mode = #tpu.pipeline_mode<synchronous>, transform_indices = @transform_7, window_bounds = array<i64: 1, 128>}, {pipeline_mode = #tpu.pipeline_mode<synchronous>, transform_indices = @transform_8, window_bounds = array<i64: 1, 128>}, {transform_indices = @transform_9, window_bounds = array<i64: 1, 16, 128>}]} {
    %c0 = arith.constant 0 : index
    %c0_0 = arith.constant 0 : index
    %c0_1 = arith.constant 0 : index
    %0 = vector.load %arg1[%c0, %c0_0, %c0_1] : memref<1x16x128xbf16, #tpu.memory_space<vmem>>, vector<1x16x128xbf16>
    %1 = vector.shape_cast %0 : vector<1x16x128xbf16> to vector<16x128xbf16>
    %c0_2 = arith.constant 0 : index
    %c0_3 = arith.constant 0 : index
    %2 = vector.load %arg4[%c0_2, %c0_3] : memref<16x16xbf16, #tpu.memory_space<vmem>>, vector<16x16xbf16>
    %c0_4 = arith.constant 0 : index
    %c0_5 = arith.constant 0 : index
    %3 = vector.load %arg5[%c0_4, %c0_5] : memref<16x16xbf16, #tpu.memory_space<vmem>>, vector<16x16xbf16>
    %cst = arith.constant dense<0.000000e+00> : vector<16x128xf32>
    %4 = tpu.matmul %2, %1, %cst {dimension_numbers = #tpu.dot_dimension_numbers<[1], [0], [0], [1], [0, 0, 1, 1], [], []>} : vector<16x16xbf16>, vector<16x128xbf16>, vector<16x128xf32> -> vector<16x128xf32>
    %5 = arith.truncf %4 : vector<16x128xf32> to vector<16x128xbf16>
    %cst_6 = arith.constant dense<0.000000e+00> : vector<16x128xf32>
    %6 = tpu.matmul %3, %1, %cst_6 {dimension_numbers = #tpu.dot_dimension_numbers<[1], [0], [0], [1], [0, 0, 1, 1], [], []>} : vector<16x16xbf16>, vector<16x128xbf16>, vector<16x128xf32> -> vector<16x128xf32>
    %7 = arith.truncf %6 : vector<16x128xf32> to vector<16x128xbf16>
    %c0_7 = arith.constant 0 : index
    %c0_8 = arith.constant 0 : index
    %c0_9 = arith.constant 0 : index
    %8 = vector.load %arg2[%c0_7, %c0_8, %c0_9] : memref<3x128x128xbf16, #tpu.memory_space<vmem>>, vector<1x128x128xbf16>
    %9 = vector.shape_cast %8 : vector<1x128x128xbf16> to vector<128x128xbf16>
    %cst_10 = arith.constant dense<0.000000e+00> : vector<16x128xf32>
    %10 = tpu.matmul %5, %9, %cst_10 {dimension_numbers = #tpu.dot_dimension_numbers<[1], [0], [0], [1], [0, 0, 1, 1], [], []>} : vector<16x128xbf16>, vector<128x128xbf16>, vector<16x128xf32> -> vector<16x128xf32>
    %c1 = arith.constant 1 : index
    %c0_11 = arith.constant 0 : index
    %c0_12 = arith.constant 0 : index
    %11 = vector.load %arg2[%c1, %c0_11, %c0_12] : memref<3x128x128xbf16, #tpu.memory_space<vmem>>, vector<1x128x128xbf16>
    %12 = vector.shape_cast %11 : vector<1x128x128xbf16> to vector<128x128xbf16>
    %cst_13 = arith.constant dense<0.000000e+00> : vector<16x128xf32>
    %13 = tpu.matmul %1, %12, %cst_13 {dimension_numbers = #tpu.dot_dimension_numbers<[1], [0], [0], [1], [0, 0, 1, 1], [], []>} : vector<16x128xbf16>, vector<128x128xbf16>, vector<16x128xf32> -> vector<16x128xf32>
    %14 = arith.addf %10, %13 : vector<16x128xf32>
    %c2 = arith.constant 2 : index
    %c0_14 = arith.constant 0 : index
    %c0_15 = arith.constant 0 : index
    %15 = vector.load %arg2[%c2, %c0_14, %c0_15] : memref<3x128x128xbf16, #tpu.memory_space<vmem>>, vector<1x128x128xbf16>
    %16 = vector.shape_cast %15 : vector<1x128x128xbf16> to vector<128x128xbf16>
    %cst_16 = arith.constant dense<0.000000e+00> : vector<16x128xf32>
    %17 = tpu.matmul %7, %16, %cst_16 {dimension_numbers = #tpu.dot_dimension_numbers<[1], [0], [0], [1], [0, 0, 1, 1], [], []>} : vector<16x128xbf16>, vector<128x128xbf16>, vector<16x128xf32> -> vector<16x128xf32>
    %18 = arith.addf %14, %17 : vector<16x128xf32>
    %c0_17 = arith.constant 0 : index
    %c0_18 = arith.constant 0 : index
    %19 = vector.load %arg6[%c0_17, %c0_18] : memref<1x128xf32, #tpu.memory_space<vmem>>, vector<1x128xf32>
    %20 = vector.broadcast %19 : vector<1x128xf32> to vector<16x128xf32>
    %21 = arith.mulf %18, %20 : vector<16x128xf32>
    %c0_19 = arith.constant 0 : index
    %c0_20 = arith.constant 0 : index
    %22 = vector.load %arg7[%c0_19, %c0_20] : memref<1x128xf32, #tpu.memory_space<vmem>>, vector<1x128xf32>
    %23 = vector.broadcast %22 : vector<1x128xf32> to vector<16x128xf32>
    %24 = arith.addf %21, %23 : vector<16x128xf32>
    %cst_21 = arith.constant 0.000000e+00 : f32
    %25 = vector.broadcast %cst_21 : f32 to vector<16x128xf32>
    %26 = arith.maximumf %24, %25 : vector<16x128xf32>
    %27 = arith.truncf %26 : vector<16x128xf32> to vector<16x128xbf16>
    %cst_22 = arith.constant dense<0.000000e+00> : vector<16x128xf32>
    %28 = tpu.matmul %2, %27, %cst_22 {dimension_numbers = #tpu.dot_dimension_numbers<[1], [0], [0], [1], [0, 0, 1, 1], [], []>} : vector<16x16xbf16>, vector<16x128xbf16>, vector<16x128xf32> -> vector<16x128xf32>
    %29 = arith.truncf %28 : vector<16x128xf32> to vector<16x128xbf16>
    %cst_23 = arith.constant dense<0.000000e+00> : vector<16x128xf32>
    %30 = tpu.matmul %3, %27, %cst_23 {dimension_numbers = #tpu.dot_dimension_numbers<[1], [0], [0], [1], [0, 0, 1, 1], [], []>} : vector<16x16xbf16>, vector<16x128xbf16>, vector<16x128xf32> -> vector<16x128xf32>
    %31 = arith.truncf %30 : vector<16x128xf32> to vector<16x128xbf16>
    %c0_24 = arith.constant 0 : index
    %c0_25 = arith.constant 0 : index
    %c0_26 = arith.constant 0 : index
    %32 = vector.load %arg3[%c0_24, %c0_25, %c0_26] : memref<3x128x128xbf16, #tpu.memory_space<vmem>>, vector<1x128x128xbf16>
    %33 = vector.shape_cast %32 : vector<1x128x128xbf16> to vector<128x128xbf16>
    %cst_27 = arith.constant dense<0.000000e+00> : vector<16x128xf32>
    %34 = tpu.matmul %29, %33, %cst_27 {dimension_numbers = #tpu.dot_dimension_numbers<[1], [0], [0], [1], [0, 0, 1, 1], [], []>} : vector<16x128xbf16>, vector<128x128xbf16>, vector<16x128xf32> -> vector<16x128xf32>
    %c1_28 = arith.constant 1 : index
    %c0_29 = arith.constant 0 : index
    %c0_30 = arith.constant 0 : index
    %35 = vector.load %arg3[%c1_28, %c0_29, %c0_30] : memref<3x128x128xbf16, #tpu.memory_space<vmem>>, vector<1x128x128xbf16>
    %36 = vector.shape_cast %35 : vector<1x128x128xbf16> to vector<128x128xbf16>
    %cst_31 = arith.constant dense<0.000000e+00> : vector<16x128xf32>
    %37 = tpu.matmul %27, %36, %cst_31 {dimension_numbers = #tpu.dot_dimension_numbers<[1], [0], [0], [1], [0, 0, 1, 1], [], []>} : vector<16x128xbf16>, vector<128x128xbf16>, vector<16x128xf32> -> vector<16x128xf32>
    %38 = arith.addf %34, %37 : vector<16x128xf32>
    %c2_32 = arith.constant 2 : index
    %c0_33 = arith.constant 0 : index
    %c0_34 = arith.constant 0 : index
    %39 = vector.load %arg3[%c2_32, %c0_33, %c0_34] : memref<3x128x128xbf16, #tpu.memory_space<vmem>>, vector<1x128x128xbf16>
    %40 = vector.shape_cast %39 : vector<1x128x128xbf16> to vector<128x128xbf16>
    %cst_35 = arith.constant dense<0.000000e+00> : vector<16x128xf32>
    %41 = tpu.matmul %31, %40, %cst_35 {dimension_numbers = #tpu.dot_dimension_numbers<[1], [0], [0], [1], [0, 0, 1, 1], [], []>} : vector<16x128xbf16>, vector<128x128xbf16>, vector<16x128xf32> -> vector<16x128xf32>
    %42 = arith.addf %38, %41 : vector<16x128xf32>
    %c0_36 = arith.constant 0 : index
    %c0_37 = arith.constant 0 : index
    %43 = vector.load %arg8[%c0_36, %c0_37] : memref<1x128xf32, #tpu.memory_space<vmem>>, vector<1x128xf32>
    %44 = vector.broadcast %43 : vector<1x128xf32> to vector<16x128xf32>
    %45 = arith.mulf %42, %44 : vector<16x128xf32>
    %c0_38 = arith.constant 0 : index
    %c0_39 = arith.constant 0 : index
    %46 = vector.load %arg9[%c0_38, %c0_39] : memref<1x128xf32, #tpu.memory_space<vmem>>, vector<1x128xf32>
    %47 = vector.broadcast %46 : vector<1x128xf32> to vector<16x128xf32>
    %48 = arith.addf %45, %47 : vector<16x128xf32>
    %49 = arith.extf %1 : vector<16x128xbf16> to vector<16x128xf32>
    %50 = arith.addf %48, %49 : vector<16x128xf32>
    %cst_40 = arith.constant 0.000000e+00 : f32
    %51 = vector.broadcast %cst_40 : f32 to vector<16x128xf32>
    %52 = arith.maximumf %50, %51 : vector<16x128xf32>
    %c0_41 = arith.constant 0 : index
    %c0_42 = arith.constant 0 : index
    %c0_43 = arith.constant 0 : index
    %53 = vector.load %arg10[%c0_41, %c0_42, %c0_43] : memref<1x16x128xf32, #tpu.memory_space<vmem>>, vector<1x16x128xf32>
    %54 = vector.shape_cast %53 : vector<1x16x128xf32> to vector<16x128xf32>
    %55 = vector.shape_cast %52 : vector<16x128xf32> to vector<1x16x128xf32>
    tpu.vector_store %arg10[%c0_41, %c0_42, %c0_43], %55 {strides = array<i32>} : memref<1x16x128xf32, #tpu.memory_space<vmem>>, vector<1x16x128xf32>,
    return
  }
  func.func @transform_0(%arg0: i32) -> (i32, i32, i32) {
    %c0_i32 = arith.constant 0 : i32
    %c0_i32_0 = arith.constant 0 : i32
    %c0_i32_1 = arith.constant 0 : i32
    return %arg0, %c0_i32, %c0_i32_0 : i32, i32, i32
  }
  func.func @transform_1(%arg0: i32) -> (i32, i32, i32) {
    %c0_i32 = arith.constant 0 : i32
    %c0_i32_0 = arith.constant 0 : i32
    %c0_i32_1 = arith.constant 0 : i32
    %c0_i32_2 = arith.constant 0 : i32
    return %c0_i32, %c0_i32_0, %c0_i32_1 : i32, i32, i32
  }
  func.func @transform_2(%arg0: i32) -> (i32, i32, i32) {
    %c0_i32 = arith.constant 0 : i32
    %c0_i32_0 = arith.constant 0 : i32
    %c0_i32_1 = arith.constant 0 : i32
    %c0_i32_2 = arith.constant 0 : i32
    return %c0_i32, %c0_i32_0, %c0_i32_1 : i32, i32, i32
  }
  func.func @transform_3(%arg0: i32) -> (i32, i32) {
    %c0_i32 = arith.constant 0 : i32
    %c0_i32_0 = arith.constant 0 : i32
    %c0_i32_1 = arith.constant 0 : i32
    return %c0_i32, %c0_i32_0 : i32, i32
  }
  func.func @transform_4(%arg0: i32) -> (i32, i32) {
    %c0_i32 = arith.constant 0 : i32
    %c0_i32_0 = arith.constant 0 : i32
    %c0_i32_1 = arith.constant 0 : i32
    return %c0_i32, %c0_i32_0 : i32, i32
  }
  func.func @transform_5(%arg0: i32) -> (i32, i32) {
    %c0_i32 = arith.constant 0 : i32
    %c0_i32_0 = arith.constant 0 : i32
    %c0_i32_1 = arith.constant 0 : i32
    return %c0_i32, %c0_i32_0 : i32, i32
  }
  func.func @transform_6(%arg0: i32) -> (i32, i32) {
    %c0_i32 = arith.constant 0 : i32
    %c0_i32_0 = arith.constant 0 : i32
    %c0_i32_1 = arith.constant 0 : i32
    return %c0_i32, %c0_i32_0 : i32, i32
  }
  func.func @transform_7(%arg0: i32) -> (i32, i32) {
    %c0_i32 = arith.constant 0 : i32
    %c0_i32_0 = arith.constant 0 : i32
    %c0_i32_1 = arith.constant 0 : i32
    return %c0_i32, %c0_i32_0 : i32, i32
  }
  func.func @transform_8(%arg0: i32) -> (i32, i32) {
    %c0_i32 = arith.constant 0 : i32
    %c0_i32_0 = arith.constant 0 : i32
    %c0_i32_1 = arith.constant 0 : i32
    return %c0_i32, %c0_i32_0 : i32, i32
  }
  func.func @transform_9(%arg0: i32) -> (i32, i32, i32) {
    %c0_i32 = arith.constant 0 : i32
    %c0_i32_0 = arith.constant 0 : i32
    %c0_i32_1 = arith.constant 0 : i32
    return %arg0, %c0_i32, %c0_i32_0 : i32, i32, i32
  }
}

</mosaic_0001>

<bundles_post_ra>
// kernel: tpu_custom_call.1
= control target key start
LH: loop header
LB: loop body
LE: loop exit
PB: predicated region body
PF: predicated region fallthrough
CT: control target
= control target key end

     0   :  { %s2461_s0 = inlined_call_operand.hbm [shape: bf16[2,16,128], index: 0, kind: input, shape index: {}]   ;;  %s2462_s1 = inlined_call_operand.hbm [shape: bf16[3,128,128], index: 1, kind: input, shape index: {}]   ;;  %s2463_s2 = inlined_call_operand.hbm [shape: bf16[3,128,128], index: 2, kind: input, shape index: {}]   ;;  %s2464_s3 = inlined_call_operand.vmem [shape: bf16[16,16], index: 3, kind: input, shape index: {}]   ;;  %s2465_s4 = inlined_call_operand.hbm [shape: bf16[16,16], index: 4, kind: input, shape index: {}]   ;;  %s2466_s5 = inlined_call_operand.vmem [shape: f32[1,128], index: 5, kind: input, shape index: {}]   ;;  %s2467_s6 = inlined_call_operand.vmem [shape: f32[1,128], index: 6, kind: input, shape index: {}]   ;;  %s2468_s7 = inlined_call_operand.vmem [shape: f32[1,128], index: 7, kind: input, shape index: {}]   ;;  %s2469_s8 = inlined_call_operand.vmem [shape: f32[1,128], index: 8, kind: input, shape index: {}]   ;;  %s2470_s9 = inlined_call_operand.hbm [shape: f32[2,16,128], index: 9, kind: output, shape index: {}]  }
   0x1   :  { %2477 = sst [smem:[#allocation17_spill]] %s2470_s9 }
   0x2   :  { %14 = vsyncpa [#allocation3], 0 }
   0x3   :  { %16 = vsyncpa [#allocation3 + $0x1], 0 }
   0x4   :  { %17 = vsyncpa [#allocation6], 0 }
   0x5   :  { %18 = vsyncpa [#allocation9], 0 }
   0x6   :  { %19 = vsyncpa [#allocation4], 0 }
   0x7   :  { %21 = vsyncpa [#allocation4 + $0x1], 0  ;;  %s2083_s30 = smov 0   ;;  %s2085_s10 = smov 0  }
   0x8   :  { %s2087_s11 = smov 0   ;;  %s2089_s12 = smov 0  }
   0x9 LB: > { %2478 = sst [smem:[#allocation15_spill]] %s2008_s30  ;;  %s2104_s13 = sadd.s32 4294967295, %s2020_s12   ;;  %s2020_s12 = sphi %s2089_s12, %s2502_s12   ;;  %s2016_s11 = sphi %s2087_s11, %s2501_s11   ;;  %s2012_s10 = sphi %s2085_s10, %s2500_s10   ;;  %s2008_s30 = sphi %s2083_s30, %s2499_s30  }
   0xa   : > { %s1394_s14 = sadd.s32 4294967294, %s2020_s12   ;;  %p47_p0 = scmp.ne.s32.totalorder %s2012_s10, %s2008_s30 }
   0xb   : > { %p2471_p1 = scmp.eq.s32.totalorder %s2104_s13, 0  ;;  %p245_p3 = scmp.eq.s32.totalorder %s1394_s14, 1 }
   0xc   : > { %p1395_p5 = scmp.ge.s32.totalorder %s2020_s12, 1  ;;  %p252_p7 = scmp.lt.s32.totalorder %s2020_s12, 3 }
   0xd   : > { %p2113_p4 = por %p2471_p1, %p47_p0  ;;  %p2118_p6 = por %p245_p3, %p47_p0 }
   0xe   : > { %p2123_p8 = pnand %p1395_p5, %p252_p7  ;;  %s2022_s18 = smov [#allocation5]  }
   0xf   : > { %s2479_s15 = scalar_select %p2113_p4, 1, 0 }
  0x10   : > { %s2480_s16 = scalar_select %p2118_p6, 1, 0 }
  0x11   : > { %s2482_s17 = scalar_select %p2123_p8, 1, 0 }
  0x12   : > { %2481 = sst [smem:[#allocation16_spill]] %s2480_s16  ;;  %s264_s19 = sshll.u32 %s2022_s18, 4  ;;  %s2127_s19 = int_to_ptr.vmem [resolvable:$true] %s264_s19 }
  0x13   : > { %p1713_p9 = pneg %p2123_p8  ;;  %s2023_s21 = smov [#allocation7]  }
  0x14   : > { %s277_s22 = sshll.u32 %s2023_s21, 4  ;;  %s2024_s23 = smov [#allocation8]   ;;  %s2138_s22 = int_to_ptr.vmem [resolvable:$true] %s277_s22 }
  0x15   : > { %p2134_p11 = pnand %p1713_p9, %p2471_p1  ;;  %s2140_s24 = sshll.u32 %s2024_s23, 4  ;;  %s294_s24 = int_to_ptr.vmem [resolvable:$true] %s2140_s24 }
  0x16   : > { %s1832_s27 = scalar_lea.hbm %s2462_s1, 3072 }
  0x17   : > { %p1833_p12 = scmp.ne.s32.totalorder %s2462_s1, %s1832_s27  ;;  %p2150_p13 = pneg %p2134_p11 }
  0x18   : > { %p1839_p5 = scmp.lt.u32.totalorder %s1832_s27, %s2462_s1 }
  0x19   : > { %p1835_p0 = pnand %p2150_p13, %p1833_p12 }
  0x1b   : > { %p1836_p3 = pneg %p1835_p0 }
  0x1d   : > { %p1841_p7 = pnand %p1839_p5, %p1836_p3 }
  0x1f   : > { %1844 = shalt.err (!%p1841_p7)
}
  0x20   : > { %s1845_s23 = scalar_lea.vmem %s2127_s19, 3072  ;;  %p1853_p2 = scmp.lt.s32.totalorder %s2127_s19, %s2127_s19 }
  0x21   : > { %p1846_p9 = scmp.ne.s32.totalorder %s2127_s19, %s1845_s23  ;;  %p1854_p6 = scmp.lt.s32.totalorder %s1845_s23, %s1845_s23 }
  0x23   : > { %p1848_p10 = pnand %p1846_p9, %p2150_p13  ;;  %p1855_p12 = por %p1854_p6, %p1853_p2 }
  0x25   : > { %p1849_p1 = pneg %p1848_p10 }
  0x27   : > { %p1856_p0 = pnand %p1855_p12, %p1849_p1 }
  0x29   : > { %1859 = shalt.err (!%p1856_p0)
}
  0x2a   : > { %s2025_s25 = smov 64   ;;  %s2026_s26 = smov 4  }
  0x2b   : > { %1716 = dma.hbm_to_vmem [thread:$0]  (!%p2134_p11), %s2462_s1, 3072, %s2127_s19, [#allocation6], %s2025_s25, %s2025_s25, %s2026_s26  }
  0x2c   : > { %s1860_s21 = scalar_lea.hbm %s2463_s2, 3072 }
  0x2d   : > { %p1861_p1 = scmp.ne.s32.totalorder %s2463_s2, %s1860_s21  ;;  %p1867_p10 = scmp.lt.u32.totalorder %s1860_s21, %s2463_s2 }
  0x2f   : > { %p1863_p2 = pnand %p1861_p1, %p2150_p13 }
  0x31   : > { %p1864_p6 = pneg %p1863_p2 }
  0x33   : > { %p1869_p3 = pnand %p1867_p10, %p1864_p6 }
  0x35   : > { %1872 = shalt.err (!%p1869_p3)
}
  0x36   : > { %s1873_s19 = scalar_lea.vmem %s2138_s22, 3072  ;;  %p1881_p12 = scmp.lt.s32.totalorder %s2138_s22, %s2138_s22 }
  0x37   : > { %p1874_p5 = scmp.ne.s32.totalorder %s2138_s22, %s1873_s19  ;;  %p1882_p0 = scmp.lt.s32.totalorder %s1873_s19, %s1873_s19 }
  0x39   : > { %p1876_p7 = pnand %p1874_p5, %p2150_p13  ;;  %p1883_p1 = por %p1882_p0, %p1881_p12 }
  0x3b   : > { %p1877_p9 = pneg %p1876_p7 }
  0x3d   : > { %p1884_p2 = pnand %p1883_p1, %p1877_p9 }
  0x3f   : > { %1887 = shalt.err (!%p1884_p2)
}
  0x40   : > { %1719 = dma.hbm_to_vmem [thread:$0]  (!%p2134_p11), %s2463_s2, 3072, %s2138_s22, [#allocation6], %s2025_s25, %s2025_s25, %s2026_s26  }
  0x41   : > { %s1888_s28 = scalar_lea.hbm %s2465_s4, 128 }
  0x42   : > { %p1889_p6 = scmp.ne.s32.totalorder %s2465_s4, %s1888_s28  ;;  %p1895_p5 = scmp.lt.u32.totalorder %s1888_s28, %s2465_s4 }
  0x44   : > { %p1891_p10 = pnand %p1889_p6, %p2150_p13 }
  0x46   : > { %p1892_p3 = pneg %p1891_p10 }
  0x48   : > { %p1897_p7 = pnand %p1895_p5, %p1892_p3 }
  0x4a   : > { %1900 = shalt.err (!%p1897_p7)
}
  0x4b   : > { %s1901_s19 = scalar_lea.vmem %s294_s24, 128  ;;  %p1909_p1 = scmp.lt.s32.totalorder %s294_s24, %s294_s24 }
  0x4c   : > { %p1902_p9 = scmp.ne.s32.totalorder %s294_s24, %s1901_s19  ;;  %p1910_p2 = scmp.lt.s32.totalorder %s1901_s19, %s1901_s19 }
  0x4e   : > { %p1904_p12 = pnand %p1902_p9, %p2150_p13  ;;  %p1911_p4 = por %p1910_p2, %p1909_p1 }
  0x50   : > { %p1905_p0 = pneg %p1904_p12 }
  0x52   : > { %p1912_p8 = pnand %p1911_p4, %p1905_p0 }
  0x54   : > { %1915 = shalt.err (!%p1912_p8)
}
  0x55   : > { %1722 = dma.hbm_to_vmem [thread:$0]  (!%p2134_p11), %s2465_s4, 128, %s294_s24, [#allocation9], %s2025_s25, %s2025_s25, %s2026_s26  }
  0x56   : > { %s2223_s14 = sadd.s32 1, %s2020_s12   ;;  %s34_s30 = sadd.s32 1, %s2016_s11 }
  0x57   : > { %s31_s20 = ssub.s32 %s2020_s12, %s2223_s14  ;;  %p41_p8 = scmp.ne.s32.totalorder %s2016_s11, %s2012_s10 }
  0x58   : > { %p32_p4 = scmp.eq.s32.totalorder %s31_s20, 0  ;;  %p42_p13 = scmp.eq.s32.totalorder %s2020_s12, 0 }
  0x59   : > { %p1734_p6 = scmp.lt.s32.totalorder %s2020_s12, 2  ;;  %p2485_p3 = scmp.eq.s32.totalorder %s2104_s13, 1 }
  0x5a   : > { %s2233_s16 = scalar_select %p32_p4, %s2016_s11, %s34_s30  }
  0x5b   : > { %p43_p10 = por %p42_p13, %p41_p8  ;;  %p2237_p5 = por %p2485_p3, %p41_p8 }
  0x5c   : > { %s319_s28 = sand.u32 1, %s2016_s11   ;;  %s1473_s29 = sshll.u32 %s2020_s12, 7 }
  0x5d   : > { %s1400_s24 = sshll.u32 %s319_s28, 3  ;;  %s2246_s23 = scalar_lea.hbm %s2461_s0, %s1473_s29 }
  0x5e   : > { %s323_s19 = scalar_lea.vmem [#allocation2], %s1400_s24  ;;  %p2248_p11 = pnand %p1734_p6, %p43_p10 }
  0x5f   : > { %s330_s22 = sshll.u32 %s323_s19, 4  ;;  %s2254_s20 = scalar_lea.sflag [#allocation3], %s319_s28  ;;  %s2252_s22 = int_to_ptr.vmem [resolvable:$true] %s330_s22 }
  0x60   : > { %s1916_s30 = scalar_lea.hbm %s2246_s23, 128  ;;  %p1918_p9 = pneg %p2248_p11 }
  0x61   : > { %p1917_p7 = scmp.ne.s32.totalorder %s2246_s23, %s1916_s30  ;;  %s1921_s18 = scalar_lea.hbm %s2461_s0, 256 }
  0x62   : > { %p1922_p1 = scmp.lt.u32.totalorder %s2246_s23, %s2461_s0  ;;  %p1923_p2 = scmp.lt.u32.totalorder %s1921_s18, %s1916_s30 }
  0x63   : > { %p1919_p12 = pnand %p1918_p9, %p1917_p7  ;;  %p1925_p8 = scmp.lt.u32.totalorder %s1916_s30, %s2246_s23 }
  0x64   : > { %p1924_p4 = por %p1923_p2, %p1922_p1 }
  0x65   : > { %p1920_p0 = pneg %p1919_p12 }
  0x66   : > { %p1926_p13 = por %p1925_p8, %p1924_p4 }
  0x68   : > { %p1927_p6 = pnand %p1926_p13, %p1920_p0 }
  0x6a   : > { %1930 = shalt.err (!%p1927_p6)
}
  0x6b   : > { %s1931_s28 = scalar_lea.vmem %s2252_s22, 128  ;;  %s2027_s29 = smov [#allocation2]  }
  0x6c   : > { %p1932_p10 = scmp.ne.s32.totalorder %s2252_s22, %s1931_s28  ;;  %s1936_s24 = sshll.u32 %s2027_s29, 4  ;;  %s1937_s24 = int_to_ptr.vmem [resolvable:$false] %s1936_s24 }
  0x6d   : > { %s1938_s21 = scalar_lea.vmem %s1937_s24, 256  ;;  %p1939_p12 = scmp.lt.s32.totalorder %s2252_s22, %s1937_s24 }
  0x6e   : > { %p1934_p3 = pnand %p1932_p10, %p1918_p9  ;;  %p1940_p1 = scmp.lt.s32.totalorder %s1938_s21, %s1931_s28 }
  0x70   : > { %p1935_p7 = pneg %p1934_p3  ;;  %p1941_p2 = por %p1940_p1, %p1939_p12 }
  0x72   : > { %p1942_p4 = pnand %p1941_p2, %p1935_p7 }
  0x74   : > { %1945 = shalt.err (!%p1942_p4)
}
  0x75   : > { %1726 = dma.hbm_to_vmem [thread:$0]  (!%p2248_p11), %s2246_s23, 128, %s2252_s22, %s2254_s20, %s2025_s25, %s2025_s25, %s2026_s26  }
  0x76   : > { %p2488_p9 = scmp.ne.s32.totalorder %s2482_s17, 0 }
  0x77   : > { %s2288_s30 = sand.u32 (!%p2488_p9), 1, %s2012_s10   ;;  %p2489_p0 = scmp.ne.s32.totalorder (!%p2488_p9), %s2479_s15, 0 }
  0x78   : > { %342 = sbr.rel (%p2488_p9) target bundleno = 1098 (0x44a), region = 56  ;;  %s1404_s18 = sshll.u32 (!%p2488_p9), %s2288_s30, 3 }
  0x79   : > { %s345_s19 = scalar_lea.sflag (!%p2488_p9), [#allocation3], %s2288_s30  ;;  %s348_s28 = scalar_lea.vmem (!%p2488_p9), [#allocation2], %s1404_s18 }
  0x7f   : > { %1991 = dma.done.wait (%p2489_p0), %s345_s19, 128  }
  0x80   : > { %1993 = vsyncadd (%p2489_p0), %s345_s19, 4294967168  ;;  %p2490_p8 = scmp.eq.s32.totalorder %s2104_s13, 0 }
  0x82   : > { %1995 = dma.done.wait (%p2490_p8), [#allocation6], 6144   ;;  %p2491_p11 = pmov %p2490_p8 }
  0x83   : > { %p2492_p13 = pmov %p2490_p8 }
  0x84   : > { %1997 = vsyncadd (%p2491_p11), [#allocation6], 4294961152 }
  0x85   : > { %1999 = dma.done.wait (%p2492_p13), [#allocation9], 128   ;;  %p2493_p6 = pmov %p2490_p8 }
  0x86   : > { %v2028_v0 = vmov 0.0   ;;  %vm2029_vm0 = vmmov 0   ;;  %v2310_v1 = vld [vmem:[%s348_s28] sm:$0xff]   ;;  %vm413_vm1 = vcmask 130048   ;;  %v2325_v3 = vld [vmem:[#allocation8] sm:$0xff]   ;;  %v1784_v5 = vld [vmem:[#allocation5 + $0x48] sm:$0xff]  }
  0x87   : > { %2001 = vsyncadd (%p2493_p6), [#allocation9], 4294967168  ;;  %1537 = vmatprep.subr.bf16.mxu0 %v2028_v0  ;;  %1539 = vmatprep.mubr.msk.bf16.mxu0 %vm2029_vm0, %v2028_v0  ;;  %v2315_v2 = vld [vmem:[%s2464_s3] sm:$0xff]   ;;  %v1783_v4 = vld [vmem:[#allocation5 + $0x40] sm:$0xff]   ;;  %s1408_s9 = sshll.u32 %s2288_s30, 4  ;;  %s1474_s28 = sshll.u32 %s2104_s13, 8 }
  0x88   : > { %1609 = vmatprep.subr.bf16.mxu1 %v2028_v0  ;;  %1611 = vmatprep.mubr.msk.bf16.mxu1 %vm2029_vm0, %v2028_v0  ;;  %v1785_v6 = vld [vmem:[#allocation5 + $0x50] sm:$0xff]   ;;  %v1786_v7 = vld [vmem:[#allocation5 + $0x58] sm:$0xff]   ;;  %v1787_v8 = vld [vmem:[#allocation5 + $0x60] sm:$0xff]   ;;  %s394_s18 = scalar_lea.vmem [#allocation10], %s1408_s9  ;;  %s2494_s25 = sld [smem:[#allocation17_spill]] }
  0x89   : > { %1538 = vmatpush3.bf16.msra.mxu0 %v2310_v1  ;;  %v1788_v9 = vld [vmem:[#allocation5 + $0x68] sm:$0xff]   ;;  %v1789_v10 = vld [vmem:[#allocation5 + $0x70] sm:$0xff]   ;;  %v1790_v11 = vld [vmem:[#allocation5 + $0x78] sm:$0xff]   ;;  %s1292_s19 = sshll.u32 %s394_s18, 4  ;;  %s1279_s23 = scalar_lea.sflag [#allocation4], %s2288_s30  ;;  %s2412_s19 = int_to_ptr.vmem [resolvable:$true] %s1292_s19 }
  0x8a   : > { %1543 = vmatprep.subr.bf16.mxu0 %v2028_v0  ;;  %v1791_v12 = vld [vmem:[#allocation5] sm:$0xff]   ;;  %v1792_v13 = vld [vmem:[#allocation5 + $0x8] sm:$0xff]   ;;  %v1793_v14 = vld [vmem:[#allocation5 + $0x10] sm:$0xff]   ;;  %s1946_s22 = scalar_lea.vmem %s2412_s19, 256  ;;  %s2030_s13 = smov [#allocation10]  }
  0x8b   : > { %v1794_v15 = vld [vmem:[#allocation5 + $0x18] sm:$0xff]   ;;  %v1795_v16 = vld [vmem:[#allocation5 + $0x20] sm:$0xff]   ;;  %v1796_v17 = vld [vmem:[#allocation5 + $0x28] sm:$0xff]   ;;  %p1947_p10 = scmp.ne.s32.totalorder %s2412_s19, %s1946_s22  ;;  %s1950_s9 = sshll.u32 %s2030_s13, 4  ;;  %s1951_s9 = int_to_ptr.vmem [resolvable:$false] %s1950_s9 }
  0x8c   : > { %1540 = vmatmul.mubr.msk.bf16.vlgmr.msra.gmra.mrb[0].mxu0 %vm413_vm1, %v2315_v2  ;;  %v1797_v18 = vld [vmem:[#allocation5 + $0x30] sm:$0xff]   ;;  %v1798_v19 = vld [vmem:[#allocation5 + $0x38] sm:$0xff]   ;;  %v1799_v23 = vld [vmem:[#allocation5 + $0x80] sm:$0xff]   ;;  %s1952_s20 = scalar_lea.vmem %s1951_s9, 512  ;;  %p1953_p12 = scmp.lt.s32.totalorder %s2412_s19, %s1951_s9 }
  0x8d   : > { %1544 = vmatpush3.bf16.msra.mxu0 %v2310_v1  ;;  %1545 = vmatprep.mubr.msk.bf16.mxu0 %vm2029_vm0, %v2028_v0  ;;  %v1800_v26 = vld [vmem:[#allocation5 + $0x88] sm:$0xff]   ;;  %v1801_v29 = vld [vmem:[#allocation5 + $0x90] sm:$0xff]   ;;  %v1802_v33 = vld [vmem:[#allocation5 + $0x98] sm:$0xff]   ;;  %p1948_p3 = pnand %p1947_p10, %p2237_p5  ;;  %p1954_p1 = scmp.lt.s32.totalorder %s1952_s20, %s1946_s22 }
  0x8e   : > { %1549 = vmatprep.subr.bf16.mxu0 %v2028_v0  ;;  %v1803_v34 = vld [vmem:[#allocation5 + $0xa0] sm:$0xff]   ;;  %v1804_v35 = vld [vmem:[#allocation5 + $0xa8] sm:$0xff]   ;;  %v1805_v36 = vld [vmem:[#allocation5 + $0xb0] sm:$0xff]   ;;  %s2417_s26 = scalar_lea.hbm %s2494_s25, %s1474_s28 }
  0x8f   : > { %v1806_v37 = vld [vmem:[#allocation5 + $0xb8] sm:$0xff]   ;;  %v1438_v38 = vld [vmem:[%s2466_s5] ss:$0 sm:$0xff]  ;;  %v1807_v51 = vld [vmem:[#allocation7 + $0x40] sm:$0xff]   ;;  %p1949_p7 = pneg %p1948_p3  ;;  %p1955_p2 = por %p1954_p1, %p1953_p12 }
  0x90   : > { %v1439_v40 = vld [vmem:[%s2467_s6] ss:$0 sm:$0xff]  ;;  %v1808_v52 = vld [vmem:[#allocation7 + $0x48] sm:$0xff]   ;;  %v1810_v54 = vld [vmem:[#allocation7 + $0x58] sm:$0xff]  }
  0x91   : > { %v1809_v53 = vld [vmem:[#allocation7 + $0x50] sm:$0xff]   ;;  %v1811_v55 = vld [vmem:[#allocation7 + $0x60] sm:$0xff]   ;;  %v1812_v56 = vld [vmem:[#allocation7 + $0x68] sm:$0xff]   ;;  %p1956_p4 = pnand %p1955_p2, %p1949_p7 }
  0x92   : > { %v1813_v57 = vld [vmem:[#allocation7 + $0x70] sm:$0xff]   ;;  %v1814_v58 = vld [vmem:[#allocation7 + $0x78] sm:$0xff]   ;;  %v1815_v59 = vld [vmem:[#allocation7] sm:$0xff]  }
  0x93   : > { %v1816_v60 = vld [vmem:[#allocation7 + $0x8] sm:$0xff]   ;;  %v1817_v61 = vld [vmem:[#allocation7 + $0x10] sm:$0xff]   ;;  %v1818_v62 = vld [vmem:[#allocation7 + $0x18] sm:$0xff]  }
  0x94   : > { %1546 = vmatmul.mubr.msk.bf16.vlgmr.msra.gmra.mrb[4].mxu0 %vm413_vm1, %v2325_v3  ;;  %v1819_v63 = vld [vmem:[#allocation7 + $0x20] sm:$0xff]  }
  0x95   : > { %1550 = vmatpush3.bf16.msra.mxu0 %v1783_v4  ;;  %1565 = vmatprep.mubr.msk.bf16.mxu0 %vm2029_vm0, %v2028_v0  ;;  %v1822_v4 = vld [vmem:[#allocation7 + $0x38] sm:$0xff]  }
  0x96   : > { %1551 = vmatprep.subr.bf16.mxu0 %v2028_v0 }
  0x99   : > { %1552 = vmatpush3.bf16.msra.mxu0 %v1784_v5 }
  0x9a   : > { %1553 = vmatprep.subr.bf16.mxu0 %v2028_v0 }
  0x9d   : > { %1554 = vmatpush3.bf16.msra.mxu0 %v1785_v6 }
  0x9e   : > { %1555 = vmatprep.subr.bf16.mxu0 %v2028_v0 }
  0xa1   : > { %1556 = vmatpush3.bf16.msra.mxu0 %v1786_v7 }
  0xa2   : > { %1557 = vmatprep.subr.bf16.mxu0 %v2028_v0 }
  0xa5   : > { %1558 = vmatpush3.bf16.msra.mxu0 %v1787_v8  ;;  %v1823_v8 = vld [vmem:[#allocation7 + $0x80] sm:$0xff]  }
  0xa6   : > { %1559 = vmatprep.subr.bf16.mxu0 %v2028_v0 }
  0xa9   : > { %1560 = vmatpush3.bf16.msra.mxu0 %v1788_v9 }
  0xaa   : > { %1561 = vmatprep.subr.bf16.mxu0 %v2028_v0 }
  0xad   : > { %1562 = vmatpush3.bf16.msra.mxu0 %v1789_v10 }
  0xae   : > { %1563 = vmatprep.subr.bf16.mxu0 %v2028_v0 }
  0xb1   : > { %1564 = vmatpush3.bf16.msra.mxu0 %v1790_v11  ;;  %v1824_v11 = vld [vmem:[#allocation7 + $0x88] sm:$0xff]  }
  0xb2   : > { %1569 = vmatprep.subr.bf16.mxu0 %v2028_v0 }
  0xb4   : > { %1566 = vmatmul.mubr.bf16.vlgmr.msra.gmra.mrb[8].mxu0 %v2310_v1 }
  0xb5   : > { %1570 = vmatpush3.bf16.msra.mxu0 %v1791_v12  ;;  %1585 = vmatprep.mubr.msk.bf16.mxu0 %vm2029_vm0, %v2028_v0 }
  0xb6   : > { %1571 = vmatprep.subr.bf16.mxu0 %v2028_v0 }
  0xb9   : > { %1572 = vmatpush3.bf16.msra.mxu0 %v1792_v13 }
  0xba   : > { %1573 = vmatprep.subr.bf16.mxu0 %v2028_v0 }
  0xbd   : > { %1574 = vmatpush3.bf16.msra.mxu0 %v1793_v14  ;;  %v1825_v14 = vld [vmem:[#allocation7 + $0x90] sm:$0xff]  }
  0xbe   : > { %1575 = vmatprep.subr.bf16.mxu0 %v2028_v0 }
  0xc1   : > { %1576 = vmatpush3.bf16.msra.mxu0 %v1794_v15 }
  0xc2   : > { %1577 = vmatprep.subr.bf16.mxu0 %v2028_v0 }
  0xc5   : > { %1578 = vmatpush3.bf16.msra.mxu0 %v1795_v16 }
  0xc6   : > { %1579 = vmatprep.subr.bf16.mxu0 %v2028_v0 }
  0xc9   : > { %1580 = vmatpush3.bf16.msra.mxu0 %v1796_v17 }
  0xca   : > { %1581 = vmatprep.subr.bf16.mxu0 %v2028_v0 }
  0xcd   : > { %1582 = vmatpush3.bf16.msra.mxu0 %v1797_v18  ;;  %v1826_v18 = vld [vmem:[#allocation7 + $0x98] sm:$0xff]  }
  0xce   : > { %1583 = vmatprep.subr.bf16.mxu0 %v2028_v0 }
  0xd1   : > { %1584 = vmatpush3.bf16.msra.mxu0 %v1798_v19  ;;  %v1827_v19 = vld [vmem:[#allocation7 + $0xa0] sm:$0xff]  }
  0xd2   : > { %1589 = vmatprep.subr.bf16.mxu0 %v2028_v0 }
 0x15f   : > { %v451_v20 = vpop.f32.mrb[0].mxu0 }
 0x160   : > { %v1541_v21 = vpop.f32.mrb[1].mxu0 }
 0x161   : > { %v454_v22 = vpop.f32.mrb[2].mxu0  ;;  %v1829_v21 = vld [vmem:[#allocation7 + $0xb0] sm:$0xff]  }
 0x162   : > { %v458_v24 = vpack.c.bf16 %v454_v22, %v451_v20  ;;  %v1542_v25 = vpop.f32.mrb[3].mxu0  ;;  %v1828_v20 = vld [vmem:[#allocation7 + $0xa8] sm:$0xff]   ;;  %v1830_v22 = vld [vmem:[#allocation7 + $0xb8] sm:$0xff]  }
 0x163   : > { %v1467_v25 = vld [vmem:[%s2469_s8] ss:$0 sm:$0xff] }
 0x164   : > { %1586 = vmatmul.mubr.bf16.vlgmr.msra.gmra.mrb[8].mxu0 %v458_v24 }
 0x165   : > { %1590 = vmatpush3.bf16.msra.mxu0 %v1799_v23  ;;  %1605 = vmatprep.mubr.msk.bf16.mxu0 %vm2029_vm0, %v2028_v0  ;;  %v1466_v23 = vld [vmem:[%s2468_s7] ss:$0 sm:$0xff] }
 0x166   : > { %1591 = vmatprep.subr.bf16.mxu0 %v2028_v0 }
 0x167   : > { %v501_v27 = vpop.f32.mrb[4].mxu0 }
 0x168   : > { %v1547_v28 = vpop.f32.mrb[5].mxu0 }
 0x169   : > { %1592 = vmatpush3.bf16.msra.mxu0 %v1800_v26  ;;  %v504_v30 = vpop.f32.mrb[6].mxu0  ;;  %v1270_v26 = vunpack.c.l.bf16 %v2310_v1 }
 0x16a   : > { %1593 = vmatprep.subr.bf16.mxu0 %v2028_v0  ;;  %v508_v31 = vpack.c.bf16 %v504_v30, %v501_v27  ;;  %v1548_v32 = vpop.f32.mrb[7].mxu0 }
 0x16d   : > { %1594 = vmatpush3.bf16.msra.mxu0 %v1801_v29 }
 0x16e   : > { %1595 = vmatprep.subr.bf16.mxu0 %v2028_v0 }
 0x171   : > { %1596 = vmatpush3.bf16.msra.mxu0 %v1802_v33 }
 0x172   : > { %1597 = vmatprep.subr.bf16.mxu0 %v2028_v0 }
 0x175   : > { %1598 = vmatpush3.bf16.msra.mxu0 %v1803_v34 }
 0x176   : > { %1599 = vmatprep.subr.bf16.mxu0 %v2028_v0 }
 0x179   : > { %1600 = vmatpush3.bf16.msra.mxu0 %v1804_v35 }
 0x17a   : > { %1601 = vmatprep.subr.bf16.mxu0 %v2028_v0 }
 0x17d   : > { %1602 = vmatpush3.bf16.msra.mxu0 %v1805_v36 }
 0x17e   : > { %1603 = vmatprep.subr.bf16.mxu0 %v2028_v0 }
 0x181   : > { %1604 = vmatpush3.bf16.msra.mxu0 %v1806_v37 }
 0x184   : > { %1606 = vmatmul.mubr.bf16.vlgmr.msra.gmra.mrb[8].mxu0 %v508_v31 }
 0x257   : > { %v819_v39 = vpop.f32.mrb[8].mxu0 }
 0x258   : > { %v835_v41 = vmul.f32 %v1438_v38, %v819_v39  ;;  %v1607_v42 = vpop.f32.mrb[9].mxu0 }
 0x259   : > { %v822_v43 = vpop.f32.mrb[10].mxu0 }
 0x25a   : > { %v844_v44 = vadd.f32 %v1439_v40, %v835_v41  ;;  %v836_v45 = vmul.f32 %v1438_v38, %v822_v43  ;;  %v1608_v46 = vpop.f32.mrb[11].mxu0 }
 0x25c   : > { %v845_v47 = vadd.f32 %v1439_v40, %v836_v45  ;;  %v846_v48 = vmax.f32 %v844_v44, 0.0 }
 0x25e   : > { %v847_v49 = vmax.f32 %v845_v47, 0.0 }
 0x260   : > { %v848_v50 = vpack.c.bf16 %v847_v49, %v846_v48 }
 0x262   : > { %1610 = vmatpush3.bf16.msra.mxu1 %v848_v50 }
 0x263   : > { %1615 = vmatprep.subr.bf16.mxu1 %v2028_v0 }
 0x265   : > { %1612 = vmatmul.mubr.msk.bf16.vlgmr.msra.gmra.mrb[0].mxu1 %vm413_vm1, %v2315_v2  ;;  %v1820_v2 = vld [vmem:[#allocation7 + $0x28] sm:$0xff]  }
 0x266   : > { %1616 = vmatpush3.bf16.msra.mxu1 %v848_v50  ;;  %1617 = vmatprep.mubr.msk.bf16.mxu1 %vm2029_vm0, %v2028_v0 }
 0x267   : > { %1621 = vmatprep.subr.bf16.mxu1 %v2028_v0 }
 0x26d   : > { %1618 = vmatmul.mubr.msk.bf16.vlgmr.msra.gmra.mrb[4].mxu1 %vm413_vm1, %v2325_v3  ;;  %v1821_v3 = vld [vmem:[#allocation7 + $0x30] sm:$0xff]  }
 0x26e   : > { %1622 = vmatpush3.bf16.msra.mxu1 %v1807_v51  ;;  %1637 = vmatprep.mubr.msk.bf16.mxu1 %vm2029_vm0, %v2028_v0 }
 0x26f   : > { %1623 = vmatprep.subr.bf16.mxu1 %v2028_v0 }
 0x272   : > { %1624 = vmatpush3.bf16.msra.mxu1 %v1808_v52 }
 0x273   : > { %1625 = vmatprep.subr.bf16.mxu1 %v2028_v0 }
 0x276   : > { %1626 = vmatpush3.bf16.msra.mxu1 %v1809_v53 }
 0x277   : > { %1627 = vmatprep.subr.bf16.mxu1 %v2028_v0 }
 0x27a   : > { %1628 = vmatpush3.bf16.msra.mxu1 %v1810_v54 }
 0x27b   : > { %1629 = vmatprep.subr.bf16.mxu1 %v2028_v0 }
 0x27e   : > { %1630 = vmatpush3.bf16.msra.mxu1 %v1811_v55 }
 0x27f   : > { %1631 = vmatprep.subr.bf16.mxu1 %v2028_v0 }
 0x282   : > { %1632 = vmatpush3.bf16.msra.mxu1 %v1812_v56 }
 0x283   : > { %1633 = vmatprep.subr.bf16.mxu1 %v2028_v0 }
 0x286   : > { %1634 = vmatpush3.bf16.msra.mxu1 %v1813_v57 }
 0x287   : > { %1635 = vmatprep.subr.bf16.mxu1 %v2028_v0 }
 0x28a   : > { %1636 = vmatpush3.bf16.msra.mxu1 %v1814_v58 }
 0x28b   : > { %1641 = vmatprep.subr.bf16.mxu1 %v2028_v0 }
 0x28d   : > { %1638 = vmatmul.mubr.bf16.vlgmr.msra.gmra.mrb[8].mxu1 %v848_v50 }
 0x28e   : > { %1642 = vmatpush3.bf16.msra.mxu1 %v1815_v59  ;;  %1657 = vmatprep.mubr.msk.bf16.mxu1 %vm2029_vm0, %v2028_v0 }
 0x28f   : > { %1643 = vmatprep.subr.bf16.mxu1 %v2028_v0 }
 0x292   : > { %1644 = vmatpush3.bf16.msra.mxu1 %v1816_v60 }
 0x293   : > { %1645 = vmatprep.subr.bf16.mxu1 %v2028_v0 }
 0x296   : > { %1646 = vmatpush3.bf16.msra.mxu1 %v1817_v61 }
 0x297   : > { %1647 = vmatprep.subr.bf16.mxu1 %v2028_v0 }
 0x29a   : > { %1648 = vmatpush3.bf16.msra.mxu1 %v1818_v62 }
 0x29b   : > { %1649 = vmatprep.subr.bf16.mxu1 %v2028_v0 }
 0x29e   : > { %1650 = vmatpush3.bf16.msra.mxu1 %v1819_v63 }
 0x29f   : > { %1651 = vmatprep.subr.bf16.mxu1 %v2028_v0 }
 0x2a2   : > { %1652 = vmatpush3.bf16.msra.mxu1 %v1820_v2 }
 0x2a3   : > { %1653 = vmatprep.subr.bf16.mxu1 %v2028_v0 }
 0x2a6   : > { %1654 = vmatpush3.bf16.msra.mxu1 %v1821_v3 }
 0x2a7   : > { %1655 = vmatprep.subr.bf16.mxu1 %v2028_v0 }
 0x2aa   : > { %1656 = vmatpush3.bf16.msra.mxu1 %v1822_v4 }
 0x2ab   : > { %1661 = vmatprep.subr.bf16.mxu1 %v2028_v0 }
 0x338   : > { %v883_v5 = vpop.f32.mrb[0].mxu1 }
 0x339   : > { %v1613_v6 = vpop.f32.mrb[1].mxu1 }
 0x33a   : > { %v886_v7 = vpop.f32.mrb[2].mxu1 }
 0x33b   : > { %v890_v9 = vpack.c.bf16 %v886_v7, %v883_v5  ;;  %v1614_v10 = vpop.f32.mrb[3].mxu1 }
 0x33d   : > { %1658 = vmatmul.mubr.bf16.vlgmr.msra.gmra.mrb[8].mxu1 %v890_v9 }
 0x33e   : > { %1662 = vmatpush3.bf16.msra.mxu1 %v1823_v8  ;;  %1677 = vmatprep.mubr.msk.bf16.mxu1 %vm2029_vm0, %v2028_v0 }
 0x33f   : > { %1663 = vmatprep.subr.bf16.mxu1 %v2028_v0 }
 0x340   : > { %v925_v12 = vpop.f32.mrb[4].mxu1 }
 0x341   : > { %v1619_v13 = vpop.f32.mrb[5].mxu1 }
 0x342   : > { %1664 = vmatpush3.bf16.msra.mxu1 %v1824_v11  ;;  %v928_v15 = vpop.f32.mrb[6].mxu1 }
 0x343   : > { %1665 = vmatprep.subr.bf16.mxu1 %v2028_v0  ;;  %v932_v16 = vpack.c.bf16 %v928_v15, %v925_v12  ;;  %v1620_v17 = vpop.f32.mrb[7].mxu1 }
 0x346   : > { %1666 = vmatpush3.bf16.msra.mxu1 %v1825_v14 }
 0x347   : > { %1667 = vmatprep.subr.bf16.mxu1 %v2028_v0 }
 0x34a   : > { %1668 = vmatpush3.bf16.msra.mxu1 %v1826_v18 }
 0x34b   : > { %1669 = vmatprep.subr.bf16.mxu1 %v2028_v0 }
 0x34e   : > { %1670 = vmatpush3.bf16.msra.mxu1 %v1827_v19 }
 0x34f   : > { %1671 = vmatprep.subr.bf16.mxu1 %v2028_v0 }
 0x352   : > { %1672 = vmatpush3.bf16.msra.mxu1 %v1828_v20 }
 0x353   : > { %1673 = vmatprep.subr.bf16.mxu1 %v2028_v0 }
 0x356   : > { %1674 = vmatpush3.bf16.msra.mxu1 %v1829_v21 }
 0x357   : > { %1675 = vmatprep.subr.bf16.mxu1 %v2028_v0  ;;  %v1271_v0 = vunpack.c.h.bf16 %v2310_v1 }
 0x35a   : > { %1676 = vmatpush3.bf16.msra.mxu1 %v1830_v22 }
 0x35d   : > { %1678 = vmatmul.mubr.bf16.vlgmr.msra.gmra.mrb[8].mxu1 %v932_v16 }
 0x430   : > { %v1243_v24 = vpop.f32.mrb[8].mxu1 }
 0x431   : > { %v1259_v27 = vmul.f32 %v1466_v23, %v1243_v24  ;;  %v1679_v28 = vpop.f32.mrb[9].mxu1 }
 0x432   : > { %v1246_v29 = vpop.f32.mrb[10].mxu1 }
 0x433   : > { %v1268_v30 = vadd.f32 %v1467_v25, %v1259_v27  ;;  %v1260_v31 = vmul.f32 %v1466_v23, %v1246_v29  ;;  %v1680_v32 = vpop.f32.mrb[11].mxu1 }
 0x435   : > { %v1272_v33 = vadd.f32 %v1270_v26, %v1268_v30  ;;  %v1269_v34 = vadd.f32 %v1467_v25, %v1260_v31 }
 0x437   : > { %v1274_v35 = vmax.f32 %v1272_v33, 0.0  ;;  %v1273_v36 = vadd.f32 %v1271_v0, %v1269_v34 }
 0x439   : > { %1276 = vst [vmem:[%s394_s18] sm:$0xff] %v1274_v35  ;;  %v1275_v1 = vmax.f32 %v1273_v36, 0.0 }
 0x43b   : > { %1277 = vst [vmem:[%s394_s18 + $0x8] sm:$0xff] %v1275_v1 }
 0x43c   : > { %1959 = shalt.err (!%p1956_p4)
}
 0x43d   : > { %s1960_s29 = scalar_lea.hbm %s2417_s26, 256  ;;  %s1964_s18 = scalar_lea.hbm %s2494_s25, 512 }
 0x43e   : > { %p1961_p9 = scmp.ne.s32.totalorder %s2417_s26, %s1960_s29  ;;  %p1965_p11 = scmp.lt.u32.totalorder %s2417_s26, %s2494_s25 }
 0x43f   : > { %p1966_p13 = scmp.lt.u32.totalorder %s1964_s18, %s1960_s29  ;;  %p1968_p10 = scmp.lt.u32.totalorder %s1960_s29, %s2417_s26 }
 0x440   : > { %p1962_p0 = pnand %p1961_p9, %p2237_p5 }
 0x441   : > { %p1967_p6 = por %p1966_p13, %p1965_p11 }
 0x442   : > { %p1963_p8 = pneg %p1962_p0 }
 0x443   : > { %p1969_p3 = por %p1968_p10, %p1967_p6 }
 0x445   : > { %p1970_p7 = pnand %p1969_p3, %p1963_p8 }
 0x447   : > { %1973 = shalt.err (!%p1970_p7)
}
 0x448   : > { %s2031_s17 = smov 128   ;;  %s2032_s22 = smov 8  }
 0x449   : > { %1711 = dma.vmem_to_hbm [thread:$0]  (%p2237_p5), %s2412_s19, 256, %s2417_s26, %s1279_s23, %s2031_s17, %s2031_s17, %s2032_s22  }
 0x44a PF: > { %s2495_s13 = sld [smem:[#allocation15_spill]]  ;;  %s2496_s9 = sld [smem:[#allocation16_spill]] }
 0x44b   : > { %p2498_p1 = scmp.ge.s32.totalorder %s2020_s12, 2 }
 0x450   : > { %s1307_s20 = sand.u32 1, %s2495_s13   ;;  %p2497_p12 = scmp.ne.s32.totalorder %s2496_s9, 0 }
 0x451   : > { %s1308_s29 = scalar_lea.sflag [#allocation4], %s1307_s20 }
 0x452   : > { %p1728_p2 = pnand %p2498_p1, %p2497_p12 }
 0x454   : > { %2003 = dma.done.wait (!%p1728_p2), %s1308_s29, 256  }
 0x455   : > { %2005 = vsyncadd (!%p1728_p2), %s1308_s29, 4294967040  ;;  %p24_p4 = scmp.ge.s32.totalorder %s2223_s14, 4   ;;  %s2499_s30 = smov %s2012_s10 }
 0x456   : > { %s2500_s10 = smov %s2016_s11  ;;  %s2501_s11 = smov %s2233_s16 }
 0x457   : > { %s2502_s12 = smov %s2223_s14  ;;  %26 = sbr.rel (!%p24_p4) target bundleno = 9 (0x9), region = 117 }
 0x45e   :  { %1313 = vsyncpa [#allocation3], 1 }
 0x45f   :  { %1315 = vsyncpa [#allocation3 + $0x1], 1 }
 0x460   :  { %1316 = vsyncpa [#allocation6], 1 }
 0x461   :  { %1317 = vsyncpa [#allocation9], 1 }
 0x462   :  { %1318 = vsyncpa [#allocation4], 1 }
 0x463   :  { %1320 = vsyncpa [#allocation4 + $0x1], 1 }

</bundles_post_ra>
